<compile_context>
chip_gen: v7x
topology: tpu7x:2x2x1
jax: 0.10.0
libtpu: 0.0.40
codegen_flags: <defaults>
</compile_context>

<pallas_src>
import functools
import math

import jax
import jax.numpy as jnp
from jax.experimental import pallas as pl
from jax.experimental.pallas import tpu as pltpu

F32 = jnp.float32
# HF uses finfo(f32).min; a large-but-finite bias is numerically identical for the
# softmax (exp underflows to 0) and avoids -inf overflow / NaN corner cases.
NEG_BIAS = -1e9


# ------------------------------ in-kernel helpers ------------------------------

def _layernorm(x, g, b, eps):
    mu = jnp.mean(x, axis=-1, keepdims=True)
    xc = x - mu
    var = jnp.mean(xc * xc, axis=-1, keepdims=True)
    return xc * jax.lax.rsqrt(var + eps) * g + b


def _gelu(y):
    # TODO(synk): HF RoBERTa 'gelu' is erf-based; tanh approximation used here.
    c = 0.7978845608028654  # sqrt(2/pi)
    return 0.5 * y * (1.0 + jnp.tanh(c * (y + 0.044715 * y * y * y)))


# ------------------------- fused encoder-stack kernel --------------------------
# grid = (B, L); batch "parallel", layer "arbitrary".
# Per grid step: one batch element, one transformer layer.  The running hidden
# state (S, H) lives in a VMEM scratch across the layer axis.

def _encoder_kernel(mask_ref, emb_ref, emb_g_ref, emb_b_ref,
                    qkv_w_ref, qkv_b_ref, ao_w_ref, ao_b_ref,
                    ln1_g_ref, ln1_b_ref, i_w_ref, i_b_ref,
                    fo_w_ref, fo_b_ref, ln2_g_ref, ln2_b_ref,
                    cls_ref, x_scr,
                    *, S, nh, dh, eps, scale):
    H = nh * dh

    @pl.when(pl.program_id(1) == 0)
    def _():
        # embedding LayerNorm (hidden_states[0]); no zero-residual materialized.
        x_scr[...] = _layernorm(emb_ref[0], emb_g_ref[...], emb_b_ref[...], eps)

    x = x_scr[...]                                                    # (S, H)

    # ---- self attention: fused QKV matmul, per-head static lane slices ----
    qkv = jnp.dot(x, qkv_w_ref[0], preferred_element_type=jnp.float32) + qkv_b_ref[0]

    # additive key mask computed in-kernel from the raw int mask
    bias = (1.0 - mask_ref[0].astype(F32)) * NEG_BIAS                 # (1, S)

    head_outs = []
    for h in range(nh):                                               # static unroll
        qh = qkv[:, h * dh:(h + 1) * dh]                              # (S, dh)
        kh = qkv[:, H + h * dh:H + (h + 1) * dh]
        vh = qkv[:, 2 * H + h * dh:2 * H + (h + 1) * dh]
        s = jnp.einsum("qd,kd->qk", qh, kh,
                       preferred_element_type=jnp.float32)            # (S, S)
        s = s * scale + bias
        m = jnp.max(s, axis=-1, keepdims=True)
        p = jnp.exp(s - m)
        p = p * pl.reciprocal(jnp.sum(p, axis=-1, keepdims=True), approx=True)
        head_outs.append(jnp.dot(p, vh, preferred_element_type=jnp.float32))
    ctx = jnp.concatenate(head_outs, axis=-1)                         # (S, H)

    attn_out = jnp.dot(ctx, ao_w_ref[0], preferred_element_type=jnp.float32) + ao_b_ref[0]
    x1 = _layernorm(attn_out + x, ln1_g_ref[0], ln1_b_ref[0], eps)

    # ---- feed forward ----
    inter = _gelu(jnp.dot(x1, i_w_ref[0], preferred_element_type=jnp.float32) + i_b_ref[0])
    ffn_out = jnp.dot(inter, fo_w_ref[0], preferred_element_type=jnp.float32) + fo_b_ref[0]
    x2 = _layernorm(ffn_out + x1, ln2_g_ref[0], ln2_b_ref[0], eps)

    x_scr[...] = x2
    cls_ref[...] = x2[0:1, :].reshape(1, 1, 1, H)                     # CLS token of this layer


def encoder_stack(mask3, emb, params, cfg):
    B, S = mask3.shape[0], mask3.shape[2]
    H, nh, L, I = cfg["hidden"], cfg["heads"], cfg["layers"], cfg["inter"]
    dh = H // nh
    scale = 1.0 / math.sqrt(dh)

    batch3 = lambda b, l: (b, 0, 0)   # per-batch, resident across layer axis
    res2 = lambda b, l: (0, 0)        # fully resident
    lyr3 = lambda b, l: (l, 0, 0)     # per-layer stacked weights

    kernel = functools.partial(_encoder_kernel, S=S, nh=nh, dh=dh,
                               eps=cfg["eps"], scale=scale)

    return pl.pallas_call(
        kernel,
        out_shape=jax.ShapeDtypeStruct((B, L, 1, H), jnp.float32),
        grid_spec=pltpu.PrefetchScalarGridSpec(
            num_scalar_prefetch=0,
            grid=(B, L),
            in_specs=[
                pl.BlockSpec((1, 1, S), batch3),        # attention mask
                pl.BlockSpec((1, S, H), batch3),        # embedding sum
                pl.BlockSpec((1, H), res2),             # emb LN gamma
                pl.BlockSpec((1, H), res2),             # emb LN beta
                pl.BlockSpec((1, H, 3 * H), lyr3),      # fused QKV weight
                pl.BlockSpec((1, 1, 3 * H), lyr3),      # fused QKV bias
                pl.BlockSpec((1, H, H), lyr3),          # attn output weight
                pl.BlockSpec((1, 1, H), lyr3),          # attn output bias
                pl.BlockSpec((1, 1, H), lyr3),          # LN1 gamma
                pl.BlockSpec((1, 1, H), lyr3),          # LN1 beta
                pl.BlockSpec((1, H, I), lyr3),          # intermediate weight
                pl.BlockSpec((1, 1, I), lyr3),          # intermediate bias
                pl.BlockSpec((1, I, H), lyr3),          # FFN output weight
                pl.BlockSpec((1, 1, H), lyr3),          # FFN output bias
                pl.BlockSpec((1, 1, H), lyr3),          # LN2 gamma
                pl.BlockSpec((1, 1, H), lyr3),          # LN2 beta
            ],
            out_specs=pl.BlockSpec((1, 1, 1, H), lambda b, l: (b, l, 0, 0)),
            scratch_shapes=[pltpu.VMEM((S, H), jnp.float32)],
        ),
        compiler_params=pltpu.CompilerParams(
            dimension_semantics=("parallel", "arbitrary")),
    )(mask3, emb, params["emb_ln_g"], params["emb_ln_b"],
      params["qkv_w"], params["qkv_b"], params["ao_w"], params["ao_b"],
      params["ln1_g"], params["ln1_b"], params["i_w"], params["i_b"],
      params["fo_w"], params["fo_b"], params["ln2_g"], params["ln2_b"])


# ------------------------------- CLR head kernel -------------------------------

def _head_kernel(cls_ref, w1_ref, b1_ref, w2_ref, b2_ref, o_ref, *, num_last):
    cls = cls_ref[...]                                   # (B, L, 1, H)
    L = cls.shape[1]
    # concat CLS of hidden_states[-1], [-2], [-3], [-4] on the feature axis
    feats = jnp.concatenate([cls[:, L - 1 - i, 0, :] for i in range(num_last)],
                            axis=-1)                     # (B, 4H)
    h = jnp.dot(feats, w1_ref[...], preferred_element_type=jnp.float32) + b1_ref[...]
    h = jnp.tanh(h)
    o_ref[...] = jnp.dot(h, w2_ref[...], preferred_element_type=jnp.float32) + b2_ref[...]


def clr_head(cls_stack, w1, b1, w2, b2):
    B = cls_stack.shape[0]
    P = w2.shape[1]
    vmem = pl.BlockSpec(memory_space=pltpu.MemorySpace.VMEM)
    return pl.pallas_call(
        functools.partial(_head_kernel, num_last=4),
        out_shape=jax.ShapeDtypeStruct((B, P), jnp.float32),
        in_specs=[vmem] * 5,
        out_specs=vmem,
    )(cls_stack, w1, b1, w2, b2)


# ----------------------------- model glue (JAX side) ---------------------------

def roberta_position_ids(input_ids, pad_id):
    # HF create_position_ids_from_input_ids
    mask = (input_ids != pad_id).astype(jnp.int32)
    return jnp.cumsum(mask, axis=1) * mask + pad_id


def phobert_clr_forward(params, input_ids, attention_mask, cfg):
    B, S = input_ids.shape
    assert cfg["layers"] >= 4  # last-4 hidden states are the last 4 layer outputs

    # embeddings (gathers kept as plain JAX glue)
    # TODO(synk): for real PhoBERT sizes keep the tables in HBM (memory_space=pl.ANY)
    # and gather rows via manual DMA instead of materializing (B, S, H) here.
    pos_ids = roberta_position_ids(input_ids, cfg["pad_id"])
    emb = (params["word_emb"][input_ids]
           + params["pos_emb"][pos_ids]
           + params["type_emb"][jnp.zeros((B, S), jnp.int32)])        # (B, S, H)

    mask3 = attention_mask.astype(jnp.int32).reshape(B, 1, S)

    cls_stack = encoder_stack(mask3, emb, params, cfg)                # (B, L, 1, H)

    return clr_head(cls_stack, params["l1_w"], params["l1_b"],
                    params["l2_w"], params["l2_b"])                   # (B, proj)


# --------------------------------- init / main ---------------------------------

def init_params(key, cfg):
    H, I, L = cfg["hidden"], cfg["inter"], cfg["layers"]

    def nrm(k, shape, scale=0.02):
        return scale * jax.random.normal(k, shape, dtype=jnp.float32)

    keys = jax.random.split(key, 9)
    return {
        "word_emb": nrm(keys[0], (cfg["vocab"], H)),
        "pos_emb": nrm(keys[1], (cfg["max_pos"], H)),
        "type_emb": nrm(keys[2], (2, H)),
        "emb_ln_g": jnp.ones((1, H), F32),
        "emb_ln_b": jnp.zeros((1, H), F32),
        # per-layer weights stacked on a leading layer axis; Q/K/V fused to one matmul
        "qkv_w": nrm(keys[3], (L, H, 3 * H)),
        "qkv_b": jnp.zeros((L, 1, 3 * H), F32),
        "ao_w": nrm(keys[4], (L, H, H)),
        "ao_b": jnp.zeros((L, 1, H), F32),
        "ln1_g": jnp.ones((L, 1, H), F32),
        "ln1_b": jnp.zeros((L, 1, H), F32),
        "i_w": nrm(keys[5], (L, H, I)),
        "i_b": jnp.zeros((L, 1, I), F32),
        "fo_w": nrm(keys[6], (L, I, H)),
        "fo_b": jnp.zeros((L, 1, H), F32),
        "ln2_g": jnp.ones((L, 1, H), F32),
        "ln2_b": jnp.zeros((L, 1, H), F32),
        # CLR projection head: linear_1 (4H -> 4H), linear_2 (4H -> proj)
        "l1_w": nrm(keys[7], (4 * H, 4 * H)),
        "l1_b": jnp.zeros((1, 4 * H), F32),
        "l2_w": nrm(keys[8], (4 * H, cfg["proj"])),
        "l2_b": jnp.zeros((1, cfg["proj"]), F32),
    }


if __name__ == "__main__":
    cfg = dict(hidden=32, heads=2, inter=64, layers=4, vocab=50, max_pos=40,
               pad_id=1, eps=1e-5, proj=64, seq=8, batch=2)

    key = jax.random.PRNGKey(0)
    pkey, ikey = jax.random.split(key)
    params = init_params(pkey, cfg)

    B, S = cfg["batch"], cfg["seq"]
    ids = jax.random.randint(ikey, (B, S), 3, cfg["vocab"], dtype=jnp.int32)
    ids = ids.at[:, 0].set(0)                       # <s> (CLS) token
    ids = ids.at[1, S - 2:].set(cfg["pad_id"])      # pad tail of second example
    attention_mask = (ids != cfg["pad_id"]).astype(jnp.int32)

    fwd = jax.jit(lambda p, i, m: phobert_clr_forward(p, i, m, cfg))
    out = jax.block_until_ready(fwd(params, ids, attention_mask))

    assert out.shape == (B, cfg["proj"]), out.shape
    assert out.dtype == jnp.float32
    assert bool(jnp.all(jnp.isfinite(out)))
    print("KERNEL_OK")
</pallas_src>

<mosaic_0001>
module attributes {stable_mosaic.version = 11 : i64} {
  func.func @_head_kernel(%arg0: memref<2x4x1x32xf32, #tpu.memory_space<vmem>>, %arg1: memref<128x128xf32, #tpu.memory_space<vmem>>, %arg2: memref<1x128xf32, #tpu.memory_space<vmem>>, %arg3: memref<128x64xf32, #tpu.memory_space<vmem>>, %arg4: memref<1x64xf32, #tpu.memory_space<vmem>>, %arg5: memref<2x64xf32, #tpu.memory_space<vmem>>) attributes {dimension_semantics = [], scalar_prefetch = 0 : i64, scratch_operands = 0 : i64, tpu.core_type = #tpu.core_type<tc>} {
    %c0 = arith.constant 0 : index
    %c0_0 = arith.constant 0 : index
    %c0_1 = arith.constant 0 : index
    %c0_2 = arith.constant 0 : index
    %0 = vector.load %arg0[%c0, %c0_0, %c0_1, %c0_2] : memref<2x4x1x32xf32, #tpu.memory_space<vmem>>, vector<2x4x1x32xf32>
    %1 = vector.extract_strided_slice %0 {offsets = [0, 3, 0, 0], sizes = [2, 1, 1, 32], strides = [1, 1, 1, 1]} : vector<2x4x1x32xf32> to vector<2x1x1x32xf32>
    %2 = vector.shape_cast %1 : vector<2x1x1x32xf32> to vector<2x32xf32>
    %3 = vector.extract_strided_slice %0 {offsets = [0, 2, 0, 0], sizes = [2, 1, 1, 32], strides = [1, 1, 1, 1]} : vector<2x4x1x32xf32> to vector<2x1x1x32xf32>
    %4 = vector.shape_cast %3 : vector<2x1x1x32xf32> to vector<2x32xf32>
    %5 = vector.extract_strided_slice %0 {offsets = [0, 1, 0, 0], sizes = [2, 1, 1, 32], strides = [1, 1, 1, 1]} : vector<2x4x1x32xf32> to vector<2x1x1x32xf32>
    %6 = vector.shape_cast %5 : vector<2x1x1x32xf32> to vector<2x32xf32>
    %7 = vector.extract_strided_slice %0 {offsets = [0, 0, 0, 0], sizes = [2, 1, 1, 32], strides = [1, 1, 1, 1]} : vector<2x4x1x32xf32> to vector<2x1x1x32xf32>
    %8 = vector.shape_cast %7 : vector<2x1x1x32xf32> to vector<2x32xf32>
    %9 = tpu.concatenate %2, %4, %6, %8 in 1 : vector<2x32xf32>, vector<2x32xf32>, vector<2x32xf32>, vector<2x32xf32> -> vector<2x128xf32>
    %c0_3 = arith.constant 0 : index
    %c0_4 = arith.constant 0 : index
    %10 = vector.load %arg1[%c0_3, %c0_4] : memref<128x128xf32, #tpu.memory_space<vmem>>, vector<128x128xf32>
    %cst = arith.constant dense<0.000000e+00> : vector<2x128xf32>
    %11 = tpu.matmul %9, %10, %cst {dimension_numbers = #tpu.dot_dimension_numbers<[1], [0], [0], [1], [0, 0, 1, 1], [], []>} : vector<2x128xf32>, vector<128x128xf32>, vector<2x128xf32> -> vector<2x128xf32>
    %c0_5 = arith.constant 0 : index
    %c0_6 = arith.constant 0 : index
    %12 = vector.load %arg2[%c0_5, %c0_6] : memref<1x128xf32, #tpu.memory_space<vmem>>, vector<1x128xf32>
    %13 = vector.broadcast %12 : vector<1x128xf32> to vector<2x128xf32>
    %14 = arith.addf %11, %13 : vector<2x128xf32>
    %15 = math.tanh %14 : vector<2x128xf32>
    %c0_7 = arith.constant 0 : index
    %c0_8 = arith.constant 0 : index
    %16 = vector.load %arg3[%c0_7, %c0_8] : memref<128x64xf32, #tpu.memory_space<vmem>>, vector<128x64xf32>
    %cst_9 = arith.constant dense<0.000000e+00> : vector<2x64xf32>
    %17 = tpu.matmul %15, %16, %cst_9 {dimension_numbers = #tpu.dot_dimension_numbers<[1], [0], [0], [1], [0, 0, 1, 1], [], []>} : vector<2x128xf32>, vector<128x64xf32>, vector<2x64xf32> -> vector<2x64xf32>
    %c0_10 = arith.constant 0 : index
    %c0_11 = arith.constant 0 : index
    %18 = vector.load %arg4[%c0_10, %c0_11] : memref<1x64xf32, #tpu.memory_space<vmem>>, vector<1x64xf32>
    %19 = vector.broadcast %18 : vector<1x64xf32> to vector<2x64xf32>
    %20 = arith.addf %17, %19 : vector<2x64xf32>
    %c0_12 = arith.constant 0 : index
    %c0_13 = arith.constant 0 : index
    %21 = vector.load %arg5[%c0_12, %c0_13] : memref<2x64xf32, #tpu.memory_space<vmem>>, vector<2x64xf32>
    tpu.vector_store %arg5[%c0_12, %c0_13], %20 {strides = array<i32>} : memref<2x64xf32, #tpu.memory_space<vmem>>, vector<2x64xf32>,
    return
  }
}

module attributes {stable_mosaic.version = 11 : i64} {
  func.func @_encoder_kernel(%arg0: i32, %arg1: i32, %arg2: memref<1x1x8xi32, #tpu.memory_space<vmem>>, %arg3: memref<1x8x32xf32, #tpu.memory_space<vmem>>, %arg4: memref<1x32xf32, #tpu.memory_space<vmem>>, %arg5: memref<1x32xf32, #tpu.memory_space<vmem>>, %arg6: memref<1x32x96xf32, #tpu.memory_space<vmem>>, %arg7: memref<1x1x96xf32, #tpu.memory_space<vmem>>, %arg8: memref<1x32x32xf32, #tpu.memory_space<vmem>>, %arg9: memref<1x1x32xf32, #tpu.memory_space<vmem>>, %arg10: memref<1x1x32xf32, #tpu.memory_space<vmem>>, %arg11: memref<1x1x32xf32, #tpu.memory_space<vmem>>, %arg12: memref<1x32x64xf32, #tpu.memory_space<vmem>>, %arg13: memref<1x1x64xf32, #tpu.memory_space<vmem>>, %arg14: memref<1x64x32xf32, #tpu.memory_space<vmem>>, %arg15: memref<1x1x32xf32, #tpu.memory_space<vmem>>, %arg16: memref<1x1x32xf32, #tpu.memory_space<vmem>>, %arg17: memref<1x1x32xf32, #tpu.memory_space<vmem>>, %arg18: memref<1x1x1x32xf32, #tpu.memory_space<vmem>>, %arg19: memref<8x32xf32, #tpu.memory_space<vmem>>) attributes {dimension_semantics = [#tpu.dimension_semantics<parallel>, #tpu.dimension_semantics<arbitrary>], iteration_bounds = array<i64: 2, 4>, scalar_prefetch = 0 : i64, scratch_operands = 1 : i64, tpu.core_type = #tpu.core_type<tc>, window_params = [{transform_indices = @transform_0, window_bounds = array<i64: 1, 1, 8>}, {transform_indices = @transform_1, window_bounds = array<i64: 1, 8, 32>}, {pipeline_mode = #tpu.pipeline_mode<synchronous>, transform_indices = @transform_2, window_bounds = array<i64: 1, 32>}, {pipeline_mode = #tpu.pipeline_mode<synchronous>, transform_indices = @transform_3, window_bounds = array<i64: 1, 32>}, {transform_indices = @transform_4, window_bounds = array<i64: 1, 32, 96>}, {transform_indices = @transform_5, window_bounds = array<i64: 1, 1, 96>}, {transform_indices = @transform_6, window_bounds = array<i64: 1, 32, 32>}, {transform_indices = @transform_7, window_bounds = array<i64: 1, 1, 32>}, {transform_indices = @transform_8, window_bounds = array<i64: 1, 1, 32>}, {transform_indices = @transform_9, window_bounds = array<i64: 1, 1, 32>}, {transform_indices = @transform_10, window_bounds = array<i64: 1, 32, 64>}, {transform_indices = @transform_11, window_bounds = array<i64: 1, 1, 64>}, {transform_indices = @transform_12, window_bounds = array<i64: 1, 64, 32>}, {transform_indices = @transform_13, window_bounds = array<i64: 1, 1, 32>}, {transform_indices = @transform_14, window_bounds = array<i64: 1, 1, 32>}, {transform_indices = @transform_15, window_bounds = array<i64: 1, 1, 32>}, {transform_indices = @transform_16, window_bounds = array<i64: 1, 1, 1, 32>}]} {
    %c0_i32 = arith.constant 0 : i32
    %0 = arith.cmpi eq, %arg1, %c0_i32 : i32
    %1 = arith.extui %0 : i1 to i32
    %c0_i32_0 = arith.constant 0 : i32
    %2 = arith.cmpi ne, %1, %c0_i32_0 : i32
    scf.if %2 {
      %c0_76 = arith.constant 0 : index
      %c0_77 = arith.constant 0 : index
      %c0_78 = arith.constant 0 : index
      %145 = vector.load %arg3[%c0_76, %c0_77, %c0_78] : memref<1x8x32xf32, #tpu.memory_space<vmem>>, vector<1x8x32xf32>
      %146 = vector.shape_cast %145 : vector<1x8x32xf32> to vector<8x32xf32>
      %c0_79 = arith.constant 0 : index
      %c0_80 = arith.constant 0 : index
      %147 = vector.load %arg4[%c0_79, %c0_80] : memref<1x32xf32, #tpu.memory_space<vmem>>, vector<1x32xf32>
      %c0_81 = arith.constant 0 : index
      %c0_82 = arith.constant 0 : index
      %148 = vector.load %arg5[%c0_81, %c0_82] : memref<1x32xf32, #tpu.memory_space<vmem>>, vector<1x32xf32>
      %cst_83 = arith.constant dense<0.000000e+00> : vector<8xf32>
      %149 = vector.multi_reduction <add>, %146, %cst_83 [1] : vector<8x32xf32> to vector<8xf32>
      %150 = vector.shape_cast %149 : vector<8xf32> to vector<8x1xf32>
      %cst_84 = arith.constant 3.200000e+01 : f32
      %151 = vector.broadcast %cst_84 : f32 to vector<8x1xf32>
      %152 = arith.divf %150, %151 : vector<8x1xf32>
      %153 = vector.broadcast %152 : vector<8x1xf32> to vector<8x32xf32>
      %154 = arith.subf %146, %153 : vector<8x32xf32>
      %155 = arith.mulf %154, %154 : vector<8x32xf32>
      %cst_85 = arith.constant dense<0.000000e+00> : vector<8xf32>
      %156 = vector.multi_reduction <add>, %155, %cst_85 [1] : vector<8x32xf32> to vector<8xf32>
      %157 = vector.shape_cast %156 : vector<8xf32> to vector<8x1xf32>
      %cst_86 = arith.constant 3.200000e+01 : f32
      %158 = vector.broadcast %cst_86 : f32 to vector<8x1xf32>
      %159 = arith.divf %157, %158 : vector<8x1xf32>
      %cst_87 = arith.constant 9.99999974E-6 : f32
      %160 = vector.broadcast %cst_87 : f32 to vector<8x1xf32>
      %161 = arith.addf %159, %160 : vector<8x1xf32>
      %162 = math.rsqrt %161 : vector<8x1xf32>
      %163 = vector.broadcast %162 : vector<8x1xf32> to vector<8x32xf32>
      %164 = arith.mulf %154, %163 : vector<8x32xf32>
      %165 = vector.broadcast %147 : vector<1x32xf32> to vector<8x32xf32>
      %166 = arith.mulf %164, %165 : vector<8x32xf32>
      %167 = vector.broadcast %148 : vector<1x32xf32> to vector<8x32xf32>
      %168 = arith.addf %166, %167 : vector<8x32xf32>
      %c0_88 = arith.constant 0 : index
      %c0_89 = arith.constant 0 : index
      %169 = vector.load %arg19[%c0_88, %c0_89] : memref<8x32xf32, #tpu.memory_space<vmem>>, vector<8x32xf32>
      tpu.vector_store %arg19[%c0_88, %c0_89], %168 {strides = array<i32>} : memref<8x32xf32, #tpu.memory_space<vmem>>, vector<8x32xf32>,
    } else {
    }
    %c0 = arith.constant 0 : index
    %c0_1 = arith.constant 0 : index
    %3 = vector.load %arg19[%c0, %c0_1] : memref<8x32xf32, #tpu.memory_space<vmem>>, vector<8x32xf32>
    %c0_2 = arith.constant 0 : index
    %c0_3 = arith.constant 0 : index
    %c0_4 = arith.constant 0 : index
    %4 = vector.load %arg6[%c0_2, %c0_3, %c0_4] : memref<1x32x96xf32, #tpu.memory_space<vmem>>, vector<1x32x96xf32>
    %5 = vector.shape_cast %4 : vector<1x32x96xf32> to vector<32x96xf32>
    %cst = arith.constant dense<0.000000e+00> : vector<8x96xf32>
    %6 = tpu.matmul %3, %5, %cst {dimension_numbers = #tpu.dot_dimension_numbers<[1], [0], [0], [1], [0, 0, 1, 1], [], []>} : vector<8x32xf32>, vector<32x96xf32>, vector<8x96xf32> -> vector<8x96xf32>
    %c0_5 = arith.constant 0 : index
    %c0_6 = arith.constant 0 : index
    %c0_7 = arith.constant 0 : index
    %7 = vector.load %arg7[%c0_5, %c0_6, %c0_7] : memref<1x1x96xf32, #tpu.memory_space<vmem>>, vector<1x1x96xf32>
    %8 = vector.shape_cast %7 : vector<1x1x96xf32> to vector<1x96xf32>
    %9 = vector.broadcast %8 : vector<1x96xf32> to vector<8x96xf32>
    %10 = arith.addf %6, %9 : vector<8x96xf32>
    %c0_8 = arith.constant 0 : index
    %c0_9 = arith.constant 0 : index
    %c0_10 = arith.constant 0 : index
    %11 = vector.load %arg2[%c0_8, %c0_9, %c0_10] : memref<1x1x8xi32, #tpu.memory_space<vmem>>, vector<1x1x8xi32>
    %12 = vector.shape_cast %11 : vector<1x1x8xi32> to vector<1x8xi32>
    %13 = arith.sitofp %12 : vector<1x8xi32> to vector<1x8xf32>
    %cst_11 = arith.constant 1.000000e+00 : f32
    %14 = vector.broadcast %cst_11 : f32 to vector<1x8xf32>
    %15 = arith.subf %14, %13 : vector<1x8xf32>
    %cst_12 = arith.constant -1.000000e+09 : f32
    %16 = vector.broadcast %cst_12 : f32 to vector<1x8xf32>
    %17 = arith.mulf %15, %16 : vector<1x8xf32>
    %18 = vector.extract_strided_slice %10 {offsets = [0, 0], sizes = [8, 16], strides = [1, 1]} : vector<8x96xf32> to vector<8x16xf32>
    %19 = vector.extract_strided_slice %10 {offsets = [0, 32], sizes = [8, 16], strides = [1, 1]} : vector<8x96xf32> to vector<8x16xf32>
    %20 = vector.extract_strided_slice %10 {offsets = [0, 64], sizes = [8, 16], strides = [1, 1]} : vector<8x96xf32> to vector<8x16xf32>
    "tpu.trace_start"() <{level = 10 : i32, message = "qd,kd->qk"}> : () -> ()
    %cst_13 = arith.constant dense<0.000000e+00> : vector<8x8xf32>
    %21 = tpu.matmul %18, %19, %cst_13 {dimension_numbers = #tpu.dot_dimension_numbers<[1], [1], [0], [0], [0, 0, 1, 0], [], []>} : vector<8x16xf32>, vector<8x16xf32>, vector<8x8xf32> -> vector<8x8xf32>
    "tpu.trace_stop"() : () -> ()
    %cst_14 = arith.constant 2.500000e-01 : f32
    %22 = vector.broadcast %cst_14 : f32 to vector<8x8xf32>
    %23 = arith.mulf %21, %22 : vector<8x8xf32>
    %24 = vector.broadcast %17 : vector<1x8xf32> to vector<8x8xf32>
    %25 = arith.addf %23, %24 : vector<8x8xf32>
    %cst_15 = arith.constant dense<0xFF800000> : vector<8xf32>
    %26 = vector.multi_reduction <maximumf>, %25, %cst_15 [1] : vector<8x8xf32> to vector<8xf32>
    %27 = vector.shape_cast %26 : vector<8xf32> to vector<8x1xf32>
    %28 = vector.broadcast %27 : vector<8x1xf32> to vector<8x8xf32>
    %29 = arith.subf %25, %28 : vector<8x8xf32>
    %30 = math.exp %29 : vector<8x8xf32>
    %cst_16 = arith.constant dense<0.000000e+00> : vector<8xf32>
    %31 = vector.multi_reduction <add>, %30, %cst_16 [1] : vector<8x8xf32> to vector<8xf32>
    %32 = vector.shape_cast %31 : vector<8xf32> to vector<8x1xf32>
    %33 = tpu.reciprocal %32 {approx = true} : vector<8x1xf32> -> vector<8x1xf32>
    %34 = vector.broadcast %33 : vector<8x1xf32> to vector<8x8xf32>
    %35 = arith.mulf %30, %34 : vector<8x8xf32>
    %cst_17 = arith.constant dense<0.000000e+00> : vector<8x16xf32>
    %36 = tpu.matmul %35, %20, %cst_17 {dimension_numbers = #tpu.dot_dimension_numbers<[1], [0], [0], [1], [0, 0, 1, 1], [], []>} : vector<8x8xf32>, vector<8x16xf32>, vector<8x16xf32> -> vector<8x16xf32>
    %37 = vector.extract_strided_slice %10 {offsets = [0, 16], sizes = [8, 16], strides = [1, 1]} : vector<8x96xf32> to vector<8x16xf32>
    %38 = vector.extract_strided_slice %10 {offsets = [0, 48], sizes = [8, 16], strides = [1, 1]} : vector<8x96xf32> to vector<8x16xf32>
    %39 = vector.extract_strided_slice %10 {offsets = [0, 80], sizes = [8, 16], strides = [1, 1]} : vector<8x96xf32> to vector<8x16xf32>
    "tpu.trace_start"() <{level = 10 : i32, message = "qd,kd->qk"}> : () -> ()
    %cst_18 = arith.constant dense<0.000000e+00> : vector<8x8xf32>
    %40 = tpu.matmul %37, %38, %cst_18 {dimension_numbers = #tpu.dot_dimension_numbers<[1], [1], [0], [0], [0, 0, 1, 0], [], []>} : vector<8x16xf32>, vector<8x16xf32>, vector<8x8xf32> -> vector<8x8xf32>
    "tpu.trace_stop"() : () -> ()
    %cst_19 = arith.constant 2.500000e-01 : f32
    %41 = vector.broadcast %cst_19 : f32 to vector<8x8xf32>
    %42 = arith.mulf %40, %41 : vector<8x8xf32>
    %43 = vector.broadcast %17 : vector<1x8xf32> to vector<8x8xf32>
    %44 = arith.addf %42, %43 : vector<8x8xf32>
    %cst_20 = arith.constant dense<0xFF800000> : vector<8xf32>
    %45 = vector.multi_reduction <maximumf>, %44, %cst_20 [1] : vector<8x8xf32> to vector<8xf32>
    %46 = vector.shape_cast %45 : vector<8xf32> to vector<8x1xf32>
    %47 = vector.broadcast %46 : vector<8x1xf32> to vector<8x8xf32>
    %48 = arith.subf %44, %47 : vector<8x8xf32>
    %49 = math.exp %48 : vector<8x8xf32>
    %cst_21 = arith.constant dense<0.000000e+00> : vector<8xf32>
    %50 = vector.multi_reduction <add>, %49, %cst_21 [1] : vector<8x8xf32> to vector<8xf32>
    %51 = vector.shape_cast %50 : vector<8xf32> to vector<8x1xf32>
    %52 = tpu.reciprocal %51 {approx = true} : vector<8x1xf32> -> vector<8x1xf32>
    %53 = vector.broadcast %52 : vector<8x1xf32> to vector<8x8xf32>
    %54 = arith.mulf %49, %53 : vector<8x8xf32>
    %cst_22 = arith.constant dense<0.000000e+00> : vector<8x16xf32>
    %55 = tpu.matmul %54, %39, %cst_22 {dimension_numbers = #tpu.dot_dimension_numbers<[1], [0], [0], [1], [0, 0, 1, 1], [], []>} : vector<8x8xf32>, vector<8x16xf32>, vector<8x16xf32> -> vector<8x16xf32>
    %56 = tpu.concatenate %36, %55 in 1 : vector<8x16xf32>, vector<8x16xf32> -> vector<8x32xf32>
    %c0_23 = arith.constant 0 : index
    %c0_24 = arith.constant 0 : index
    %c0_25 = arith.constant 0 : index
    %57 = vector.load %arg8[%c0_23, %c0_24, %c0_25] : memref<1x32x32xf32, #tpu.memory_space<vmem>>, vector<1x32x32xf32>
    %58 = vector.shape_cast %57 : vector<1x32x32xf32> to vector<32x32xf32>
    %cst_26 = arith.constant dense<0.000000e+00> : vector<8x32xf32>
    %59 = tpu.matmul %56, %58, %cst_26 {dimension_numbers = #tpu.dot_dimension_numbers<[1], [0], [0], [1], [0, 0, 1, 1], [], []>} : vector<8x32xf32>, vector<32x32xf32>, vector<8x32xf32> -> vector<8x32xf32>
    %c0_27 = arith.constant 0 : index
    %c0_28 = arith.constant 0 : index
    %c0_29 = arith.constant 0 : index
    %60 = vector.load %arg9[%c0_27, %c0_28, %c0_29] : memref<1x1x32xf32, #tpu.memory_space<vmem>>, vector<1x1x32xf32>
    %61 = vector.shape_cast %60 : vector<1x1x32xf32> to vector<1x32xf32>
    %62 = vector.broadcast %61 : vector<1x32xf32> to vector<8x32xf32>
    %63 = arith.addf %59, %62 : vector<8x32xf32>
    %64 = arith.addf %63, %3 : vector<8x32xf32>
    %c0_30 = arith.constant 0 : index
    %c0_31 = arith.constant 0 : index
    %c0_32 = arith.constant 0 : index
    %65 = vector.load %arg10[%c0_30, %c0_31, %c0_32] : memref<1x1x32xf32, #tpu.memory_space<vmem>>, vector<1x1x32xf32>
    %66 = vector.shape_cast %65 : vector<1x1x32xf32> to vector<1x32xf32>
    %c0_33 = arith.constant 0 : index
    %c0_34 = arith.constant 0 : index
    %c0_35 = arith.constant 0 : index
    %67 = vector.load %arg11[%c0_33, %c0_34, %c0_35] : memref<1x1x32xf32, #tpu.memory_space<vmem>>, vector<1x1x32xf32>
    %68 = vector.shape_cast %67 : vector<1x1x32xf32> to vector<1x32xf32>
    %cst_36 = arith.constant dense<0.000000e+00> : vector<8xf32>
    %69 = vector.multi_reduction <add>, %64, %cst_36 [1] : vector<8x32xf32> to vector<8xf32>
    %70 = vector.shape_cast %69 : vector<8xf32> to vector<8x1xf32>
    %cst_37 = arith.constant 3.200000e+01 : f32
    %71 = vector.broadcast %cst_37 : f32 to vector<8x1xf32>
    %72 = arith.divf %70, %71 : vector<8x1xf32>
    %73 = vector.broadcast %72 : vector<8x1xf32> to vector<8x32xf32>
    %74 = arith.subf %64, %73 : vector<8x32xf32>
    %75 = arith.mulf %74, %74 : vector<8x32xf32>
    %cst_38 = arith.constant dense<0.000000e+00> : vector<8xf32>
    %76 = vector.multi_reduction <add>, %75, %cst_38 [1] : vector<8x32xf32> to vector<8xf32>
    %77 = vector.shape_cast %76 : vector<8xf32> to vector<8x1xf32>
    %cst_39 = arith.constant 3.200000e+01 : f32
    %78 = vector.broadcast %cst_39 : f32 to vector<8x1xf32>
    %79 = arith.divf %77, %78 : vector<8x1xf32>
    %cst_40 = arith.constant 9.99999974E-6 : f32
    %80 = vector.broadcast %cst_40 : f32 to vector<8x1xf32>
    %81 = arith.addf %79, %80 : vector<8x1xf32>
    %82 = math.rsqrt %81 : vector<8x1xf32>
    %83 = vector.broadcast %82 : vector<8x1xf32> to vector<8x32xf32>
    %84 = arith.mulf %74, %83 : vector<8x32xf32>
    %85 = vector.broadcast %66 : vector<1x32xf32> to vector<8x32xf32>
    %86 = arith.mulf %84, %85 : vector<8x32xf32>
    %87 = vector.broadcast %68 : vector<1x32xf32> to vector<8x32xf32>
    %88 = arith.addf %86, %87 : vector<8x32xf32>
    %c0_41 = arith.constant 0 : index
    %c0_42 = arith.constant 0 : index
    %c0_43 = arith.constant 0 : index
    %89 = vector.load %arg12[%c0_41, %c0_42, %c0_43] : memref<1x32x64xf32, #tpu.memory_space<vmem>>, vector<1x32x64xf32>
    %90 = vector.shape_cast %89 : vector<1x32x64xf32> to vector<32x64xf32>
    %cst_44 = arith.constant dense<0.000000e+00> : vector<8x64xf32>
    %91 = tpu.matmul %88, %90, %cst_44 {dimension_numbers = #tpu.dot_dimension_numbers<[1], [0], [0], [1], [0, 0, 1, 1], [], []>} : vector<8x32xf32>, vector<32x64xf32>, vector<8x64xf32> -> vector<8x64xf32>
    %c0_45 = arith.constant 0 : index
    %c0_46 = arith.constant 0 : index
    %c0_47 = arith.constant 0 : index
    %92 = vector.load %arg13[%c0_45, %c0_46, %c0_47] : memref<1x1x64xf32, #tpu.memory_space<vmem>>, vector<1x1x64xf32>
    %93 = vector.shape_cast %92 : vector<1x1x64xf32> to vector<1x64xf32>
    %94 = vector.broadcast %93 : vector<1x64xf32> to vector<8x64xf32>
    %95 = arith.addf %91, %94 : vector<8x64xf32>
    %cst_48 = arith.constant 5.000000e-01 : f32
    %96 = vector.broadcast %cst_48 : f32 to vector<8x64xf32>
    %97 = arith.mulf %96, %95 : vector<8x64xf32>
    %cst_49 = arith.constant 4.471500e-02 : f32
    %98 = vector.broadcast %cst_49 : f32 to vector<8x64xf32>
    %99 = arith.mulf %98, %95 : vector<8x64xf32>
    %100 = arith.mulf %99, %95 : vector<8x64xf32>
    %101 = arith.mulf %100, %95 : vector<8x64xf32>
    %102 = arith.addf %95, %101 : vector<8x64xf32>
    %cst_50 = arith.constant 0.797884583 : f32
    %103 = vector.broadcast %cst_50 : f32 to vector<8x64xf32>
    %104 = arith.mulf %103, %102 : vector<8x64xf32>
    %105 = math.tanh %104 : vector<8x64xf32>
    %cst_51 = arith.constant 1.000000e+00 : f32
    %106 = vector.broadcast %cst_51 : f32 to vector<8x64xf32>
    %107 = arith.addf %106, %105 : vector<8x64xf32>
    %108 = arith.mulf %97, %107 : vector<8x64xf32>
    %c0_52 = arith.constant 0 : index
    %c0_53 = arith.constant 0 : index
    %c0_54 = arith.constant 0 : index
    %109 = vector.load %arg14[%c0_52, %c0_53, %c0_54] : memref<1x64x32xf32, #tpu.memory_space<vmem>>, vector<1x64x32xf32>
    %110 = vector.shape_cast %109 : vector<1x64x32xf32> to vector<64x32xf32>
    %cst_55 = arith.constant dense<0.000000e+00> : vector<8x32xf32>
    %111 = tpu.matmul %108, %110, %cst_55 {dimension_numbers = #tpu.dot_dimension_numbers<[1], [0], [0], [1], [0, 0, 1, 1], [], []>} : vector<8x64xf32>, vector<64x32xf32>, vector<8x32xf32> -> vector<8x32xf32>
    %c0_56 = arith.constant 0 : index
    %c0_57 = arith.constant 0 : index
    %c0_58 = arith.constant 0 : index
    %112 = vector.load %arg15[%c0_56, %c0_57, %c0_58] : memref<1x1x32xf32, #tpu.memory_space<vmem>>, vector<1x1x32xf32>
    %113 = vector.shape_cast %112 : vector<1x1x32xf32> to vector<1x32xf32>
    %114 = vector.broadcast %113 : vector<1x32xf32> to vector<8x32xf32>
    %115 = arith.addf %111, %114 : vector<8x32xf32>
    %116 = arith.addf %115, %88 : vector<8x32xf32>
    %c0_59 = arith.constant 0 : index
    %c0_60 = arith.constant 0 : index
    %c0_61 = arith.constant 0 : index
    %117 = vector.load %arg16[%c0_59, %c0_60, %c0_61] : memref<1x1x32xf32, #tpu.memory_space<vmem>>, vector<1x1x32xf32>
    %118 = vector.shape_cast %117 : vector<1x1x32xf32> to vector<1x32xf32>
    %c0_62 = arith.constant 0 : index
    %c0_63 = arith.constant 0 : index
    %c0_64 = arith.constant 0 : index
    %119 = vector.load %arg17[%c0_62, %c0_63, %c0_64] : memref<1x1x32xf32, #tpu.memory_space<vmem>>, vector<1x1x32xf32>
    %120 = vector.shape_cast %119 : vector<1x1x32xf32> to vector<1x32xf32>
    %cst_65 = arith.constant dense<0.000000e+00> : vector<8xf32>
    %121 = vector.multi_reduction <add>, %116, %cst_65 [1] : vector<8x32xf32> to vector<8xf32>
    %122 = vector.shape_cast %121 : vector<8xf32> to vector<8x1xf32>
    %cst_66 = arith.constant 3.200000e+01 : f32
    %123 = vector.broadcast %cst_66 : f32 to vector<8x1xf32>
    %124 = arith.divf %122, %123 : vector<8x1xf32>
    %125 = vector.broadcast %124 : vector<8x1xf32> to vector<8x32xf32>
    %126 = arith.subf %116, %125 : vector<8x32xf32>
    %127 = arith.mulf %126, %126 : vector<8x32xf32>
    %cst_67 = arith.constant dense<0.000000e+00> : vector<8xf32>
    %128 = vector.multi_reduction <add>, %127, %cst_67 [1] : vector<8x32xf32> to vector<8xf32>
    %129 = vector.shape_cast %128 : vector<8xf32> to vector<8x1xf32>
    %cst_68 = arith.constant 3.200000e+01 : f32
    %130 = vector.broadcast %cst_68 : f32 to vector<8x1xf32>
    %131 = arith.divf %129, %130 : vector<8x1xf32>
    %cst_69 = arith.constant 9.99999974E-6 : f32
    %132 = vector.broadcast %cst_69 : f32 to vector<8x1xf32>
    %133 = arith.addf %131, %132 : vector<8x1xf32>
    %134 = math.rsqrt %133 : vector<8x1xf32>
    %135 = vector.broadcast %134 : vector<8x1xf32> to vector<8x32xf32>
    %136 = arith.mulf %126, %135 : vector<8x32xf32>
    %137 = vector.broadcast %118 : vector<1x32xf32> to vector<8x32xf32>
    %138 = arith.mulf %136, %137 : vector<8x32xf32>
    %139 = vector.broadcast %120 : vector<1x32xf32> to vector<8x32xf32>
    %140 = arith.addf %138, %139 : vector<8x32xf32>
    %c0_70 = arith.constant 0 : index
    %c0_71 = arith.constant 0 : index
    %141 = vector.load %arg19[%c0_70, %c0_71] : memref<8x32xf32, #tpu.memory_space<vmem>>, vector<8x32xf32>
    tpu.vector_store %arg19[%c0_70, %c0_71], %140 {strides = array<i32>} : memref<8x32xf32, #tpu.memory_space<vmem>>, vector<8x32xf32>,
    %142 = vector.extract_strided_slice %140 {offsets = [0, 0], sizes = [1, 32], strides = [1, 1]} : vector<8x32xf32> to vector<1x32xf32>
    %143 = vector.shape_cast %142 : vector<1x32xf32> to vector<1x1x1x32xf32>
    %c0_72 = arith.constant 0 : index
    %c0_73 = arith.constant 0 : index
    %c0_74 = arith.constant 0 : index
    %c0_75 = arith.constant 0 : index
    %144 = vector.load %arg18[%c0_72, %c0_73, %c0_74, %c0_75] : memref<1x1x1x32xf32, #tpu.memory_space<vmem>>, vector<1x1x1x32xf32>
    tpu.vector_store %arg18[%c0_72, %c0_73, %c0_74, %c0_75], %143 {strides = array<i32>} : memref<1x1x1x32xf32, #tpu.memory_space<vmem>>, vector<1x1x1x32xf32>,
    return
  }
  func.func @transform_0(%arg0: i32, %arg1: i32) -> (i32, i32, i32) {
    %c0_i32 = arith.constant 0 : i32
    %c0_i32_0 = arith.constant 0 : i32
    %c0_i32_1 = arith.constant 0 : i32
    return %arg0, %c0_i32, %c0_i32_0 : i32, i32, i32
  }
  func.func @transform_1(%arg0: i32, %arg1: i32) -> (i32, i32, i32) {
    %c0_i32 = arith.constant 0 : i32
    %c0_i32_0 = arith.constant 0 : i32
    %c0_i32_1 = arith.constant 0 : i32
    return %arg0, %c0_i32, %c0_i32_0 : i32, i32, i32
  }
  func.func @transform_2(%arg0: i32, %arg1: i32) -> (i32, i32) {
    %c0_i32 = arith.constant 0 : i32
    %c0_i32_0 = arith.constant 0 : i32
    %c0_i32_1 = arith.constant 0 : i32
    return %c0_i32, %c0_i32_0 : i32, i32
  }
  func.func @transform_3(%arg0: i32, %arg1: i32) -> (i32, i32) {
    %c0_i32 = arith.constant 0 : i32
    %c0_i32_0 = arith.constant 0 : i32
    %c0_i32_1 = arith.constant 0 : i32
    return %c0_i32, %c0_i32_0 : i32, i32
  }
  func.func @transform_4(%arg0: i32, %arg1: i32) -> (i32, i32, i32) {
    %c0_i32 = arith.constant 0 : i32
    %c0_i32_0 = arith.constant 0 : i32
    %c0_i32_1 = arith.constant 0 : i32
    return %arg1, %c0_i32, %c0_i32_0 : i32, i32, i32
  }
  func.func @transform_5(%arg0: i32, %arg1: i32) -> (i32, i32, i32) {
    %c0_i32 = arith.constant 0 : i32
    %c0_i32_0 = arith.constant 0 : i32
    %c0_i32_1 = arith.constant 0 : i32
    return %arg1, %c0_i32, %c0_i32_0 : i32, i32, i32
  }
  func.func @transform_6(%arg0: i32, %arg1: i32) -> (i32, i32, i32) {
    %c0_i32 = arith.constant 0 : i32
    %c0_i32_0 = arith.constant 0 : i32
    %c0_i32_1 = arith.constant 0 : i32
    return %arg1, %c0_i32, %c0_i32_0 : i32, i32, i32
  }
  func.func @transform_7(%arg0: i32, %arg1: i32) -> (i32, i32, i32) {
    %c0_i32 = arith.constant 0 : i32
    %c0_i32_0 = arith.constant 0 : i32
    %c0_i32_1 = arith.constant 0 : i32
    return %arg1, %c0_i32, %c0_i32_0 : i32, i32, i32
  }
  func.func @transform_8(%arg0: i32, %arg1: i32) -> (i32, i32, i32) {
    %c0_i32 = arith.constant 0 : i32
    %c0_i32_0 = arith.constant 0 : i32
    %c0_i32_1 = arith.constant 0 : i32
    return %arg1, %c0_i32, %c0_i32_0 : i32, i32, i32
  }
  func.func @transform_9(%arg0: i32, %arg1: i32) -> (i32, i32, i32) {
    %c0_i32 = arith.constant 0 : i32
    %c0_i32_0 = arith.constant 0 : i32
    %c0_i32_1 = arith.constant 0 : i32
    return %arg1, %c0_i32, %c0_i32_0 : i32, i32, i32
  }
  func.func @transform_10(%arg0: i32, %arg1: i32) -> (i32, i32, i32) {
    %c0_i32 = arith.constant 0 : i32
    %c0_i32_0 = arith.constant 0 : i32
    %c0_i32_1 = arith.constant 0 : i32
    return %arg1, %c0_i32, %c0_i32_0 : i32, i32, i32
  }
  func.func @transform_11(%arg0: i32, %arg1: i32) -> (i32, i32, i32) {
    %c0_i32 = arith.constant 0 : i32
    %c0_i32_0 = arith.constant 0 : i32
    %c0_i32_1 = arith.constant 0 : i32
    return %arg1, %c0_i32, %c0_i32_0 : i32, i32, i32
  }
  func.func @transform_12(%arg0: i32, %arg1: i32) -> (i32, i32, i32) {
    %c0_i32 = arith.constant 0 : i32
    %c0_i32_0 = arith.constant 0 : i32
    %c0_i32_1 = arith.constant 0 : i32
    return %arg1, %c0_i32, %c0_i32_0 : i32, i32, i32
  }
  func.func @transform_13(%arg0: i32, %arg1: i32) -> (i32, i32, i32) {
    %c0_i32 = arith.constant 0 : i32
    %c0_i32_0 = arith.constant 0 : i32
    %c0_i32_1 = arith.constant 0 : i32
    return %arg1, %c0_i32, %c0_i32_0 : i32, i32, i32
  }
  func.func @transform_14(%arg0: i32, %arg1: i32) -> (i32, i32, i32) {
    %c0_i32 = arith.constant 0 : i32
    %c0_i32_0 = arith.constant 0 : i32
    %c0_i32_1 = arith.constant 0 : i32
    return %arg1, %c0_i32, %c0_i32_0 : i32, i32, i32
  }
  func.func @transform_15(%arg0: i32, %arg1: i32) -> (i32, i32, i32) {
    %c0_i32 = arith.constant 0 : i32
    %c0_i32_0 = arith.constant 0 : i32
    %c0_i32_1 = arith.constant 0 : i32
    return %arg1, %c0_i32, %c0_i32_0 : i32, i32, i32
  }
  func.func @transform_16(%arg0: i32, %arg1: i32) -> (i32, i32, i32, i32) {
    %c0_i32 = arith.constant 0 : i32
    %c0_i32_0 = arith.constant 0 : i32
    %c0_i32_1 = arith.constant 0 : i32
    return %arg0, %arg1, %c0_i32, %c0_i32_0 : i32, i32, i32, i32
  }
}

</mosaic_0001>

<bundles_post_ra>
// kernel: _lambda_.3
= control target key start
LH: loop header
LB: loop body
LE: loop exit
PB: predicated region body
PF: predicated region fallthrough
CT: control target
= control target key end

     0   :  { %v35_v0 = vlaneseq  ;;  %v512_v1 = vmov 1966171168   ;;  %v513_v11 = vmov 0.0|0.0   ;;  %vm514_vm0 = vmmov 0   ;;  %s516_s15 = smov 32   ;;  %s517_s16 = smov 96   ;;  %s698_s0 = inlined_call_operand.vmem [shape: f32[2,4,1,32], index: 0, kind: input, shape index: {}]   ;;  %s699_s1 = inlined_call_operand.vmem [shape: f32[128,128], index: 1, kind: input, shape index: {}]   ;;  %s700_s2 = inlined_call_operand.vmem [shape: f32[1,128], index: 2, kind: input, shape index: {}]   ;;  %s701_s3 = inlined_call_operand.vmem [shape: f32[128,64], index: 3, kind: input, shape index: {}]   ;;  %s702_s4 = inlined_call_operand.vmem [shape: f32[1,64], index: 4, kind: input, shape index: {}]   ;;  %s703_s5 = inlined_call_operand.hbm [shape: f32[2,64], index: 5, kind: output, shape index: {}]  }
   0x1   :  { %v33_v2 = vunpack.c.l.s4 %v512_v1  ;;  %v484_v3 = vld.sshfl [vmem:[%s698_s0 + $0x2] sm:$0x5 pattern:$0x75316420]  ;;  %v114_v9 = vld [vmem:[%s699_s1 + $0x8] sm:$0xff]  ;;  %422 = vmatprep.subr.bf16.mxu0 %v513_v11  ;;  %v115_v13 = vld [vmem:[%s699_s1 + $0x10] sm:$0xff]  ;;  %446 = vmatprep.subr.bf16.mxu1 %v513_v11 }
   0x2   :  { %v36_v4 = vshrl.u32 %v35_v0, 7  ;;  %v485_v5 = vld.sshfl [vmem:[%s698_s0 + $0x1] sm:$0x5 pattern:$0x75316420]  ;;  %v116_v14 = vld [vmem:[%s699_s1 + $0x18] sm:$0xff] }
   0x3   :  { %v34_v6 = vunpack.c.0.s8 %v33_v2  ;;  %v486_v7 = vld.sshfl [vmem:[%s698_s0] sm:$0x5 pattern:$0x75316420]  ;;  %v515_v15 = vmov 0.0   ;;  %v426_v16 = vpack.c.bf16 %v116_v14, %v115_v13  ;;  %v118_v20 = vld [vmem:[%s699_s1 + $0x28] sm:$0xff] }
   0x4   :  { %v113_v8 = vld [vmem:[%s699_s1] sm:$0xff]  ;;  %384 = vmatprep.mubr.msk.f32.mxu0 %vm514_vm0, %v515_v15  ;;  %419 = vmatprep.mubr.msk.f32.mxu1 %vm514_vm0, %v515_v15  ;;  %v208_v22 = vld [vmem:[%s701_s3 + $0x8] sm:$0xff]  ;;  %v209_v25 = vld [vmem:[%s701_s3 + $0x10] sm:$0xff] }
   0x5   :  { %v565_v10 = vsub.s32 %v34_v6, %v36_v4  ;;  %v423_v12 = vpack.c.bf16 %v114_v9, %v113_v8  ;;  %v117_v19 = vld [vmem:[%s699_s1 + $0x20] sm:$0xff]  ;;  %v210_v26 = vld [vmem:[%s701_s3 + $0x18] sm:$0xff]  ;;  %v119_v28 = vld [vmem:[%s699_s1 + $0x30] sm:$0xff] }
   0x6   :  { %v207_v21 = vld [vmem:[%s701_s3] sm:$0xff]  ;;  %v429_v27 = vpack.c.bf16 %v118_v20, %v117_v19  ;;  %v120_v29 = vld [vmem:[%s699_s1 + $0x38] sm:$0xff]  ;;  %v450_v30 = vpack.c.bf16 %v210_v26, %v209_v25  ;;  %v212_v32 = vld [vmem:[%s701_s3 + $0x28] sm:$0xff] }
   0x7   :  { %424 = vmatpush3.bf16.msra.mxu0 %v423_v12  ;;  %v63_v17 = vrot.slane %v484_v3, %v565_v10  ;;  %v103_v18 = vrot.slane %v486_v7, %v565_v10  ;;  %v83_v23 = vrot.slane %v485_v5, %v565_v10  ;;  %v447_v24 = vpack.c.bf16 %v208_v22, %v207_v21  ;;  %v211_v31 = vld [vmem:[%s701_s3 + $0x20] sm:$0xff] }
   0x8   :  { %425 = vmatprep.subr.bf16.mxu0 %v513_v11 }
   0x9   :  { %64 = vrot.lane.b32.xlu0 %v63_v17, %s516_s15  ;;  %104 = vrot.lane.b32.xlu1 %v103_v18, %s517_s16 }
   0xa   :  { %448 = vmatpush3.bf16.msra.mxu1 %v447_v24 }
   0xb   :  { %427 = vmatpush3.bf16.msra.mxu0 %v426_v16  ;;  %449 = vmatprep.subr.bf16.mxu1 %v513_v11 }
   0xc   :  { %428 = vmatprep.subr.bf16.mxu0 %v513_v11 }
   0xd   :  { %10 = vsyncpa [#allocation3], 0  ;;  %s518_s29 = smov 64   ;;  %v432_v33 = vpack.c.bf16 %v120_v29, %v119_v28  ;;  %v121_v34 = vld [vmem:[%s699_s1 + $0x40] sm:$0xff]  ;;  %v122_v35 = vld [vmem:[%s699_s1 + $0x48] sm:$0xff]  ;;  %v453_v36 = vpack.c.bf16 %v212_v32, %v211_v31  ;;  %vm107_vm1 = vcmask 261120  }
   0xe   :  { %84 = vrot.lane.b32.xlu0 %v83_v23, %s518_s29  ;;  %451 = vmatpush3.bf16.msra.mxu1 %v450_v30  ;;  %v213_v37 = vld [vmem:[%s701_s3 + $0x30] sm:$0xff]  ;;  %v214_v38 = vld [vmem:[%s701_s3 + $0x38] sm:$0xff]  ;;  %v435_v39 = vpack.c.bf16 %v122_v35, %v121_v34  ;;  %v215_v43 = vld [vmem:[%s701_s3 + $0x40] sm:$0xff]  ;;  %vm109_vm2 = vcmask 523264   ;;  %vm111_vm3 = vcmask 785408   ;;  %vm300_vm4 = vcmask 517120  }
   0xf   :  { %430 = vmatpush3.bf16.msra.mxu0 %v429_v27  ;;  %452 = vmatprep.subr.bf16.mxu1 %v513_v11  ;;  %v123_v40 = vld [vmem:[%s699_s1 + $0x50] sm:$0xff]  ;;  %v124_v41 = vld [vmem:[%s699_s1 + $0x58] sm:$0xff]  ;;  %v456_v42 = vpack.c.bf16 %v214_v38, %v213_v37  ;;  %v216_v44 = vld [vmem:[%s701_s3 + $0x48] sm:$0xff] }
  0x10   :  { %431 = vmatprep.subr.bf16.mxu0 %v513_v11  ;;  %v438_v45 = vpack.c.bf16 %v124_v41, %v123_v40  ;;  %v125_v46 = vld [vmem:[%s699_s1 + $0x60] sm:$0xff]  ;;  %v126_v47 = vld [vmem:[%s699_s1 + $0x68] sm:$0xff]  ;;  %v459_v48 = vpack.c.bf16 %v216_v44, %v215_v43  ;;  %v127_v50 = vld [vmem:[%s699_s1 + $0x70] sm:$0xff] }
  0x11   :  { %v441_v49 = vpack.c.bf16 %v126_v47, %v125_v46  ;;  %v128_v51 = vld [vmem:[%s699_s1 + $0x78] sm:$0xff]  ;;  %v487_v53 = vld.sshfl [vmem:[%s698_s0 + $0x3] sm:$0x5 pattern:$0x75316420]  ;;  %v217_v61 = vld [vmem:[%s701_s3 + $0x50] sm:$0xff] }
  0x12   :  { %454 = vmatpush3.bf16.msra.mxu1 %v453_v36  ;;  %v444_v52 = vpack.c.bf16 %v128_v51, %v127_v50  ;;  %v45_v54 = vrot.slane %v487_v53, %v565_v10  ;;  %v218_v62 = vld [vmem:[%s701_s3 + $0x58] sm:$0xff]  ;;  %v219_v0 = vld [vmem:[%s701_s3 + $0x60] sm:$0xff]  ;;  %v220_v1 = vld [vmem:[%s701_s3 + $0x68] sm:$0xff] }
  0x13   :  { %433 = vmatpush3.bf16.msra.mxu0 %v432_v33  ;;  %455 = vmatprep.subr.bf16.mxu1 %v513_v11  ;;  %v462_v63 = vpack.c.bf16 %v218_v62, %v217_v61  ;;  %v465_v2 = vpack.c.bf16 %v220_v1, %v219_v0  ;;  %v221_v3 = vld [vmem:[%s701_s3 + $0x70] sm:$0xff]  ;;  %v222_v4 = vld [vmem:[%s701_s3 + $0x78] sm:$0xff]  ;;  %v316_v6 = vld [vmem:[%s700_s2] ss:$0 sm:$0xff]  ;;  %s519_s3 = smov [#allocation2]  }
  0x14   :  { %434 = vmatprep.subr.bf16.mxu0 %v513_v11  ;;  %v468_v5 = vpack.c.bf16 %v222_v4, %v221_v3  ;;  %v317_v12 = vld [vmem:[%s702_s4] ss:$0 sm:$0xff]  ;;  %s308_s20 = sshll.u32 %s519_s3, 4  ;;  %s309_s20 = int_to_ptr.vmem [resolvable:$true] %s308_s20 }
  0x15   :  { %s488_s21 = scalar_lea.vmem %s309_s20, 32  ;;  %p493_p1 = scmp.lt.s32.totalorder %s309_s20, %s309_s20 }
  0x16   :  { %457 = vmatpush3.bf16.msra.mxu1 %v456_v42  ;;  %p489_p0 = scmp.ne.s32.totalorder %s309_s20, %s488_s21  ;;  %p494_p2 = scmp.lt.s32.totalorder %s488_s21, %s488_s21 }
  0x17   :  { %436 = vmatpush3.bf16.msra.mxu0 %v435_v39  ;;  %458 = vmatprep.subr.bf16.mxu1 %v513_v11 }
  0x18   :  { %437 = vmatprep.subr.bf16.mxu0 %v513_v11  ;;  %p495_p3 = por %p494_p2, %p493_p1 }
  0x1a   :  { %460 = vmatpush3.bf16.msra.mxu1 %v459_v48  ;;  %p496_p4 = pnand %p495_p3, %p489_p0 }
  0x1b   :  { %439 = vmatpush3.bf16.msra.mxu0 %v438_v45  ;;  %461 = vmatprep.subr.bf16.mxu1 %v513_v11 }
  0x1c   :  { %440 = vmatprep.subr.bf16.mxu0 %v513_v11 }
  0x1e   :  { %463 = vmatpush3.bf16.msra.mxu1 %v462_v63 }
  0x1f   :  { %442 = vmatpush3.bf16.msra.mxu0 %v441_v49  ;;  %464 = vmatprep.subr.bf16.mxu1 %v513_v11 }
  0x20   :  { %443 = vmatprep.subr.bf16.mxu0 %v513_v11 }
  0x22   :  { %466 = vmatpush3.bf16.msra.mxu1 %v465_v2 }
  0x23   :  { %445 = vmatpush3.bf16.msra.mxu0 %v444_v52  ;;  %467 = vmatprep.subr.bf16.mxu1 %v513_v11 }
  0x26   :  { %469 = vmatpush3.bf16.msra.mxu1 %v468_v5 }
  0x7b   :  { %v65_v55 = vpop.permute.xlu0 %64  ;;  %v105_v56 = vpop.permute.xlu1 %104 }
  0x7c   :  { %v108_v57 = vsel %vm107_vm1, %v45_v54, %v65_v55 }
  0x80   :  { %v85_v58 = vpop.permute.xlu0 %84 }
  0x81   :  { %v110_v59 = vsel %vm109_vm2, %v108_v57, %v85_v58 }
  0x82   :  { %v112_v60 = vsel %vm111_vm3, %v110_v59, %v105_v56 }
  0x83   :  { %385 = vmatmul.mubr.f32.vlgmr.msra.gmra.mrb[0].mxu0 %v112_v60 }
 0x156   :  { %v202_v7 = vpop.f32.mrb[0].mxu0 }
 0x157   :  { %v203_v8 = vadd.f32 %v316_v6, %v202_v7  ;;  %v386_v9 = vpop.f32.mrb[1].mxu0 }
 0x159   :  { %482 = vtanh.f32 %v203_v8 }
 0x163   :  { %v483_v10 = vpop.eup %482 }
 0x164   :  { %420 = vmatmul.mubr.f32.vlgmr.msra.gmra.mrb[0].mxu1 %v483_v10 }
 0x237   :  { %v296_v13 = vpop.f32.mrb[0].mxu1 }
 0x238   :  { %v297_v11 = vadd.f32 %v317_v12, %v296_v13  ;;  %v421_v14 = vpop.f32.mrb[1].mxu1 }
 0x23a   :  { %301 = vst.msk [vmem:[#allocation2] sm:$0x3] %vm300_vm4, %v297_v11 }
 0x23b   :  { %499 = shalt.err (!%p496_p4)
}
 0x23c   :  { %s500_s23 = scalar_lea.hbm %s703_s5, 32 }
 0x23d   :  { %p501_p5 = scmp.ne.s32.totalorder %s703_s5, %s500_s23  ;;  %p504_p6 = scmp.lt.u32.totalorder %s500_s23, %s703_s5 }
 0x23f   :  { %p506_p7 = pnand %p504_p6, %p501_p5 }
 0x241   :  { %509 = shalt.err (!%p506_p7)
}
 0x242   :  { %311 = dma.vmem_to_hbm [thread:$0]  %s309_s20, 32, %s703_s5, [#allocation3]  }
 0x243   :  { %510 = dma.done.wait [#allocation3], 32  }
 0x244   :  { %511 = vsyncadd [#allocation3], 4294967264 }
 0x245   :  { %315 = vsyncpa [#allocation3], 1 }

// kernel: _lambda_.2
= control target key start
LH: loop header
LB: loop body
LE: loop exit
PB: predicated region body
PF: predicated region fallthrough
CT: control target
= control target key end

     0   :  { %s2124_s21 = smov 0   ;;  %s2126_s22 = smov 0   ;;  %s2380_s0 = inlined_call_operand.vmem [shape: s32[2,1,8], index: 0, kind: input, shape index: {}]   ;;  %s2381_s1 = inlined_call_operand.vmem [shape: f32[2,8,32], index: 1, kind: input, shape index: {}]   ;;  %s2382_s2 = inlined_call_operand.vmem [shape: f32[1,32], index: 2, kind: input, shape index: {}]   ;;  %s2383_s3 = inlined_call_operand.vmem [shape: f32[1,32], index: 3, kind: input, shape index: {}]   ;;  %s2384_s4 = inlined_call_operand.vmem [shape: f32[4,32,96], index: 4, kind: input, shape index: {}]   ;;  %s2385_s5 = inlined_call_operand.vmem [shape: f32[4,1,96], index: 5, kind: input, shape index: {}]   ;;  %s2386_s6 = inlined_call_operand.vmem [shape: f32[4,32,32], index: 6, kind: input, shape index: {}]   ;;  %s2387_s7 = inlined_call_operand.vmem [shape: f32[4,1,32], index: 7, kind: input, shape index: {}]   ;;  %s2388_s8 = inlined_call_operand.vmem [shape: f32[4,1,32], index: 8, kind: input, shape index: {}]   ;;  %s2389_s9 = inlined_call_operand.vmem [shape: f32[4,1,32], index: 9, kind: input, shape index: {}]   ;;  %s2390_s10 = inlined_call_operand.vmem [shape: f32[4,32,64], index: 10, kind: input, shape index: {}]   ;;  %s2391_s11 = inlined_call_operand.vmem [shape: f32[4,1,64], index: 11, kind: input, shape index: {}]   ;;  %s2392_s12 = inlined_call_operand.vmem [shape: f32[4,64,32], index: 12, kind: input, shape index: {}]   ;;  %s2393_s13 = inlined_call_operand.vmem [shape: f32[4,1,32], index: 13, kind: input, shape index: {}]   ;;  %s2394_s14 = inlined_call_operand.vmem [shape: f32[4,1,32], index: 14, kind: input, shape index: {}]   ;;  %s2395_s15 = inlined_call_operand.vmem [shape: f32[4,1,32], index: 15, kind: input, shape index: {}]   ;;  %s2396_s16 = inlined_call_operand.vmem [shape: f32[2,4,1,32], index: 16, kind: output, shape index: {}]  }
   0x1   :  { %2402 = sst [smem:[#allocation10_spill]] %s2380_s0  ;;  %s2128_s23 = smov 0  }
   0x2   :  { %2403 = sst [smem:[#allocation11_spill]] %s2381_s1  ;;  %s2130_s24 = smov 0  }
   0x3   :  { %2404 = sst [smem:[#allocation12_spill]] %s2382_s2  ;;  %s2132_s25 = smov 0  }
   0x4   :  { %2405 = sst [smem:[#allocation13_spill]] %s2383_s3 }
   0x5   :  { %2406 = sst [smem:[#allocation14_spill]] %s2384_s4 }
   0x6   :  { %2407 = sst [smem:[#allocation15_spill]] %s2386_s6 }
   0x7   :  { %2408 = sst [smem:[#allocation16_spill]] %s2390_s10 }
   0x8   :  { %2409 = sst [smem:[#allocation17_spill]] %s2396_s16 }
   0x9 LB: > { %2410 = sst [smem:[#allocation3_spill]] %s2012_s21  ;;  %s35_s26 = sadd.s32 1, %s2020_s23  ;;  %s2028_s25 = sphi %s2132_s25, %s26_s25   ;;  %s2024_s24 = sphi %s2130_s24, %s2440_s24   ;;  %s2020_s23 = sphi %s2128_s23, %s2439_s23   ;;  %s2016_s22 = sphi %s2126_s22, %s2438_s22   ;;  %s2012_s21 = sphi %s2124_s21, %s2437_s21  }
   0xa   : > { %2411 = sst [smem:[#allocation4_spill]] %s2020_s23  ;;  %s38_s27 = sadd.s32 1, %s2024_s24 }
   0xb   : > { %2412 = sst [smem:[#allocation5_spill]] %s2024_s24  ;;  %p36_p0 = scmp.ge.s32.totalorder %s35_s26, 4 }
   0xc   : > { %2413 = sst [smem:[#allocation6_spill]] %s2028_s25  ;;  %p1753_p1 = scmp.ge.s32.totalorder %s2028_s25, 1 }
   0xd   : > { %p587_p2 = scmp.lt.s32.totalorder %s2028_s25, 9  ;;  %s2442_s26 = smov (%p36_p0, %s35_s26), 0 }
   0xe   : > { %2414 = sst [smem:[#allocation7_spill]] %s2442_s26  ;;  %s2444_s27 = smov (!%p36_p0, %s38_s27), %s2024_s24 }
   0xf   : > { %p588_p3 = pnand %p1753_p1, %p587_p2  ;;  %p40_p4 = scmp.ge.s32.totalorder %s2444_s27, 2 }
  0x11   : > { %s2446_s27 = smov (%p40_p4, %s2444_s27), 0  ;;  %591 = sbr.rel (%p588_p3) target bundleno = 2866 (0xb32), region = 84 }
  0x12   : > { %2415 = sst [smem:[#allocation8_spill]] %s2446_s27 }
  0x18   : > { %p685_p5 = scmp.lt.s32.totalorder %s2016_s22, 1  ;;  %p692_p6 = scmp.lt.s32.totalorder %s2012_s21, 3 }
  0x19   : > { %s2417_s1 = sld [smem:[#allocation11_spill]]  ;;  %s2418_s4 = sld [smem:[#allocation14_spill]] }
  0x1a   : > { %s2448_s22 = smov (!%p685_p5, %s2016_s22), 1  ;;  %s2420_s6 = sld [smem:[#allocation15_spill]] }
  0x1b   : > { %s2160_s28 = scalar_select %p692_p6, %s2012_s21, 3 }
  0x1c   : > { %s1754_s18 = sshll.u32 %s2448_s22, 3  ;;  %s2421_s10 = sld [smem:[#allocation16_spill]] }
  0x1d   : > { %s1787_s26 = sshll.u32 %s2160_s28, 5  ;;  %s1763_s2 = sshll.u32 %s2448_s22, 2 }
  0x1e   : > { %s2226_s0 = sadd.s32 %s1763_s2, %s2160_s28  ;;  %s2422_s19 = sld [smem:[#allocation17_spill]] }
  0x1f   : > { %s691_s27 = scalar_lea.vmem %s2417_s1, %s1754_s18  ;;  %s2174_s24 = scalar_lea.vmem %s2418_s4, %s1787_s26 }
  0x20   : > { %2419 = sst [smem:[#allocation9_spill]] %s2174_s24  ;;  %s2183_s17 = scalar_lea.vmem %s2420_s6, %s1787_s26 }
  0x21   : > { %s1790_s6 = sshll.u32 %s2160_s28, 6  ;;  %s732_s24 = scalar_lea.vmem %s2394_s14, %s2160_s28 }
  0x22   : > { %s2200_s25 = scalar_lea.vmem %s2421_s10, %s1787_s26  ;;  %s2214_s16 = scalar_lea.vmem %s2392_s12, %s1790_s6 }
  0x23   : > { %s735_s4 = scalar_lea.vmem %s2395_s15, %s2160_s28  ;;  %s2423_s10 = sld [smem:[#allocation3_spill]] }
  0x24   : > { %s742_s18 = scalar_lea.vmem %s2422_s19, %s2226_s0 }
  0x29   : > { %p1764_p7 = scmp.ne.s32.totalorder %s2423_s10, 0 }
  0x2a   : > { %v747_v0 = vld [vmem:[%s691_s27] sm:$0xff] (!%p1764_p7)  ;;  %vm750_vm0 = vcmask (!%p1764_p7), 261120   ;;  %s2424_s10 = sld [smem:[#allocation12_spill]] (!%p1764_p7)  ;;  %s2425_s20 = sld [smem:[#allocation13_spill]] (!%p1764_p7) }
  0x2b   : > { %746 = sbr.rel (%p1764_p7) target bundleno = 357 (0x165), region = 88  ;;  %v751_v1 = vsel (!%p1764_p7), %vm750_vm0, %v747_v0, 0.0 }
  0x2c   : > { %752 = vadd.xlane.f32.xlu0 (!%p1764_p7), %v751_v1 }
  0x30   : > { %v1765_v11 = vld [vmem:[%s2424_s10] ss:$0 sm:$0xff] (!%p1764_p7) }
  0x31   : > { %v1766_v13 = vld [vmem:[%s2425_s20] ss:$0 sm:$0xff] (!%p1764_p7) }
  0xb9   : > { %v753_v2 = vpop.xlane.xlu0 %752 }
  0xba   : > { %v755_v3 = vmul.f32 0.03125, %v753_v2 }
  0xbc   : > { %v756_v4 = vsub.f32 %v747_v0, %v755_v3 }
  0xbe   : > { %v757_v5 = vmul.f32 %v756_v4, %v756_v4 }
  0xc0   : > { %v758_v6 = vsel %vm750_vm0, %v757_v5, 0.0 }
  0xc1   : > { %759 = vadd.xlane.f32.xlu0 %v758_v6 }
 0x14e   : > { %v760_v7 = vpop.xlane.xlu0 %759 }
 0x14f   : > { %v761_v8 = vmul.f32 0.03125, %v760_v7 }
 0x151   : > { %v762_v9 = vadd.f32 1e-05, %v761_v8 }
 0x153   : > { %1974 = vrsqrt.f32 %v762_v9 }
 0x15d   : > { %v1975_v10 = vpop.eup %1974 }
 0x15e   : > { %v764_v12 = vmul.f32 %v1975_v10, %v756_v4 }
 0x160   : > { %v771_v14 = vmul.f32 %v1765_v11, %v764_v12 }
 0x162   : > { %v778_v15 = vadd.f32 %v1766_v13, %v771_v14 }
 0x164   : > { %779 = vst.msk [vmem:[#allocation2] sm:$0xff] %vm750_vm0, %v778_v15 }
 0x165 PF: > { %s2426_s29 = sld [smem:[#allocation9_spill]]  ;;  %v2030_v19 = vmov 0.0|0.0   ;;  %vm2031_vm1 = vmmov 0   ;;  %v2032_v22 = vmov 0.0   ;;  %vm792_vm2 = vcmask 261120   ;;  %s2427_s23 = scalar_lea.vmem %s2385_s5, %s2160_s28  ;;  %v1216_v4 = vld [vmem:[%s2183_s17] sm:$0xff] }
 0x166   : > { %1895 = vmatprep.subr.bf16.mxu1 %v2030_v19  ;;  %1831 = vmatprep.mubr.msk.f32.mxu1 %vm2031_vm1, %v2032_v22  ;;  %v1767_v25 = vld [vmem:[%s2427_s23] ss:$0 sm:$0xff]  ;;  %s2033_s2 = smov 112   ;;  %s2034_s21 = smov 96   ;;  %vm873_vm3 = vcmask 130048   ;;  %v950_v34 = vlaneseq  ;;  %vm956_vm4 = vcmask 64512  }
 0x167   : > { %1844 = vmatprep.subr.mxu0 %v2032_v22  ;;  %1846 = vmatprep.mubr.msk.f32.mxu0 %vm2031_vm1, %v2032_v22  ;;  %s2035_s19 = smov 80   ;;  %s2428_s10 = sld [smem:[#allocation10_spill]]  ;;  %v1217_v5 = vld [vmem:[%s2183_s17 + $0x8] sm:$0xff]  ;;  %v1218_v6 = vld [vmem:[%s2183_s17 + $0x10] sm:$0xff]  ;;  %v1219_v8 = vld [vmem:[%s2183_s17 + $0x18] sm:$0xff]  ;;  %vm1439_vm5 = vcmask 523264  }
 0x168   : > { %v951_v36 = vshrl.u32 %v950_v34, 7  ;;  %s2037_s1 = smov 64   ;;  %v1902_v7 = vpack.c.bf16 %v1217_v5, %v1216_v4  ;;  %v1905_v9 = vpack.c.bf16 %v1219_v8, %v1218_v6  ;;  %s2038_s20 = smov 16   ;;  %vm1544_vm6 = vcmask 253952  }
 0x169   : > { %s2430_s30 = scalar_lea.vmem %s2387_s7, %s2160_s28 }
 0x16a   : > { %v952_v38 = vsub.s32 0, %v951_v36 }
 0x16b   : > { %v781_v16 = vld [vmem:[%s2426_s29] sm:$0xff]  ;;  %v782_v17 = vld [vmem:[%s2426_s29 + $0x8] sm:$0xff]  ;;  %v783_v18 = vld [vmem:[%s2426_s29 + $0x10] sm:$0xff] }
 0x16c   : > { %v1896_v20 = vpack.c.bf16 %v782_v17, %v781_v16  ;;  %v784_v21 = vld [vmem:[%s2426_s29 + $0x18] sm:$0xff]  ;;  %v2253_v24 = vld [vmem:[#allocation2] sm:$0xff] }
 0x16d   : > { %v1899_v23 = vpack.c.bf16 %v784_v21, %v783_v18  ;;  %s2429_s27 = scalar_lea.vmem %s2428_s10, %s2448_s22  ;;  %s2036_s22 = smov 48   ;;  %v1775_v16 = vld [vmem:[%s2430_s30] ss:$0 sm:$0xff] }
 0x16e   : > { %1897 = vmatpush3.bf16.msra.mxu1 %v1896_v20  ;;  %v866_v32 = vld [vmem:[%s2429_s27] sm:$0x1]  ;;  %s2433_s10 = scalar_lea.vmem %s2391_s11, %s2160_s28 }
 0x16f   : > { %1898 = vmatprep.subr.bf16.mxu1 %v2030_v19  ;;  %v867_v33 = vcvt.s32.f32 %v866_v32  ;;  %v1334_v32 = vld [vmem:[%s2200_s25 + $0x18] sm:$0xff] }
 0x171   : > { %v868_v35 = vsub.f32 1.0, %v867_v33 }
 0x172   : > { %1900 = vmatpush3.bf16.msra.mxu1 %v1899_v23 }
 0x173   : > { %1834 = vmatprep.subr.mxu1 %v2032_v22  ;;  %v869_v37 = vmul.f32 -1e+09, %v868_v35 }
 0x175   : > { %1832 = vmatmul.mubr.msk.f32.vlgmr.msra.gmra.mrb[0].mxu1 %vm792_vm2, %v2253_v24  ;;  %v953_v39 = vrot.slane %v869_v37, %v952_v38 }
 0x176   : > { %1836 = vmatprep.mubr.msk.f32.mxu1 %vm2031_vm1, %v2032_v22 }
 0x248   : > { %v862_v26 = vpop.f32.mrb[0].mxu1 }
 0x249   : > { %v863_v27 = vadd.f32 %v1767_v25, %v862_v26  ;;  %v1833_v28 = vpop.f32.mrb[1].mxu1 }
 0x24b   : > { %1044 = vrot.lane.b32.xlu1 %v863_v27, %s2033_s2  ;;  %871 = vrot.lane.b32.xlu0 %v863_v27, %s2034_s21  ;;  %s2431_s2 = scalar_lea.vmem %s2388_s8, %s2160_s28 }
 0x24c   : > { %v1777_v38 = vld [vmem:[%s2431_s2] ss:$0 sm:$0xff] }
 0x24f   : > { %1046 = vrot.lane.b32.xlu0 %v863_v27, %s2035_s19 }
 0x2bd   : > { %v872_v29 = vpop.permute.xlu0 %871  ;;  %v1045_v31 = vpop.permute.xlu1 %1044 }
 0x2be   : > { %1835 = vmatpush3.xpose.msk.msra.mxu1 %vm873_vm3, %v872_v29  ;;  %v1331_v29 = vld [vmem:[%s2200_s25] sm:$0xff] }
 0x2bf   : > { %1839 = vmatprep.subr.mxu1 %v2032_v22 }
 0x2c1   : > { %1837 = vmatmul.mubr.msk.f32.vlgmr.msra.gmra.mrb[2].mxu1 %vm873_vm3, %v863_v27  ;;  %v1047_v30 = vpop.permute.xlu0 %1046 }
 0x2c2   : > { %1845 = vmatpush3.xpose.msk.msra.mxu0 %vm873_vm3, %v1047_v30  ;;  %1841 = vmatprep.mubr.msk.f32.mxu1 %vm2031_vm1, %v2032_v22  ;;  %v1332_v30 = vld [vmem:[%s2200_s25 + $0x8] sm:$0xff] }
 0x2c3   : > { %1901 = vmatprep.subr.bf16.mxu0 %v2030_v19 }
 0x2c5   : > { %1847 = vmatmul.mubr.msk.f32.vlgmr.msra.gmra.mrb[0].mxu0 %vm873_vm3, %v1045_v31  ;;  %v1908_v31 = vpack.c.bf16 %v1332_v30, %v1331_v29 }
 0x2c6   : > { %1862 = vmatprep.mubr.msk.f32.mxu0 %vm2031_vm1, %v2032_v22  ;;  %1903 = vmatpush3.bf16.msra.mxu0 %v1902_v7 }
 0x2c7   : > { %1904 = vmatprep.subr.bf16.mxu0 %v2030_v19 }
 0x2ca   : > { %1906 = vmatpush3.bf16.msra.mxu0 %v1905_v9 }
 0x2cb   : > { %1913 = vmatprep.subr.bf16.mxu0 %v2030_v19 }
 0x394   : > { %v944_v40 = vpop.f32.mrb[2].mxu1 }
 0x395   : > { %v948_v41 = vmul.f32 0.25, %v944_v40  ;;  %v1838_v42 = vpop.f32.mrb[3].mxu1 }
 0x397   : > { %v955_v43 = vadd.f32 %v953_v39, %v948_v41 }
 0x398   : > { %v1118_v44 = vpop.f32.mrb[0].mxu0 }
 0x399   : > { %v1122_v45 = vmul.f32 0.25, %v1118_v44  ;;  %v1848_v46 = vpop.f32.mrb[1].mxu0  ;;  %v957_v47 = vsel %vm956_vm4, %v955_v43, -inf  ;;  %v1425_v44 = vld [vmem:[%s2214_s16 + $0x8] sm:$0xff] }
 0x39a   : > { %958 = vmax.xlane.f32.xlu1 %v957_v47  ;;  %v1426_v46 = vld [vmem:[%s2214_s16 + $0x10] sm:$0xff]  ;;  %v1427_v47 = vld [vmem:[%s2214_s16 + $0x18] sm:$0xff] }
 0x39b   : > { %v1123_v48 = vadd.f32 %v1122_v45, %v953_v39 }
 0x39d   : > { %v1124_v49 = vsel %vm956_vm4, %v1123_v48, -inf }
 0x39e   : > { %1125 = vmax.xlane.f32.xlu0 %v1124_v49  ;;  %v1428_v49 = vld [vmem:[%s2214_s16 + $0x20] sm:$0xff] }
 0x427   : > { %v959_v50 = vpop.xlane.xlu1 %958 }
 0x428   : > { %v960_v51 = vsub.f32 %v955_v43, %v959_v50  ;;  %v1424_v43 = vld [vmem:[%s2214_s16] sm:$0xff]  ;;  %v1429_v50 = vld [vmem:[%s2214_s16 + $0x28] sm:$0xff] }
 0x429   : > { %v1914_v45 = vpack.c.bf16 %v1425_v44, %v1424_v43 }
 0x42a   : > { %v961_v52 = vmul.f32 1.442695, %v960_v51  ;;  %v1920_v51 = vpack.c.bf16 %v1429_v50, %v1428_v49 }
 0x42b   : > { %v1126_v53 = vpop.xlane.xlu0 %1125 }
 0x42c   : > { %1976 = vpow2.f32 %v961_v52  ;;  %v1127_v54 = vsub.f32 %v1123_v48, %v1126_v53  ;;  %v1917_v48 = vpack.c.bf16 %v1427_v47, %v1426_v46  ;;  %v1430_v52 = vld [vmem:[%s2214_s16 + $0x30] sm:$0xff]  ;;  %v1431_v53 = vld [vmem:[%s2214_s16 + $0x38] sm:$0xff] }
 0x42e   : > { %v1128_v55 = vmul.f32 1.442695, %v1127_v54  ;;  %v1923_v54 = vpack.c.bf16 %v1431_v53, %v1430_v52 }
 0x430   : > { %1978 = vpow2.f32 %v1128_v55  ;;  %v1779_v55 = vld [vmem:[%s2433_s10] ss:$0 sm:$0xff] }
 0x436   : > { %v1977_v56 = vpop.eup %1976 }
 0x437   : > { %v963_v57 = vsel %vm956_vm4, %v1977_v56, 0.0 }
 0x438   : > { %964 = vadd.xlane.f32.xlu0 %v963_v57 }
 0x43a   : > { %v1979_v58 = vpop.eup %1978 }
 0x43b   : > { %v1130_v59 = vsel %vm956_vm4, %v1979_v58, 0.0 }
 0x43c   : > { %1131 = vadd.xlane.f32.xlu1 %v1130_v59 }
 0x44d   : > { %1135 = vrot.lane.b32.xlu1 %v863_v27, %s2036_s22  ;;  %s2434_s22 = scalar_lea.vmem %s2393_s13, %s2160_s28 }
 0x44e   : > { %968 = vrot.lane.b32.xlu0 %v863_v27, %s2037_s1 }
 0x4c5   : > { %v965_v60 = vpop.xlane.xlu0 %964 }
 0x4c6   : > { %1980 = vrcp.f32 %v965_v60 }
 0x4c9   : > { %v969_v61 = vpop.permute.xlu0 %968  ;;  %v1132_v62 = vpop.xlane.xlu1 %1131 }
 0x4ca   : > { %1982 = vrcp.f32 %v1132_v62  ;;  %1840 = vmatpush3.msra.mxu1 %v969_v61 }
 0x4cb   : > { %1849 = vmatprep.subr.mxu1 %v2032_v22 }
 0x4cd   : > { %v1136_v1 = vpop.permute.xlu1 %1135 }
 0x4d0   : > { %v1981_v63 = vpop.eup %1980 }
 0x4d1   : > { %v967_v0 = vmul.f32 %v1981_v63, %v1977_v56 }
 0x4d3   : > { %1842 = vmatmul.mubr.msk.f32.vlgmr.msra.gmra.mrb[4].mxu1 %vm956_vm4, %v967_v0 }
 0x4d4   : > { %v1983_v2 = vpop.eup %1982  ;;  %1850 = vmatpush3.msra.mxu1 %v1136_v1  ;;  %1851 = vmatprep.mubr.msk.f32.mxu1 %vm2031_vm1, %v2032_v22 }
 0x4d5   : > { %v1134_v3 = vmul.f32 %v1983_v2, %v1979_v58  ;;  %1907 = vmatprep.subr.bf16.mxu1 %v2030_v19 }
 0x4d7   : > { %1852 = vmatmul.mubr.msk.f32.vlgmr.msra.gmra.mrb[6].mxu1 %vm956_vm4, %v1134_v3  ;;  %v1781_v3 = vld [vmem:[%s2434_s22] ss:$0 sm:$0xff] }
 0x4d8   : > { %1873 = vmatprep.mubr.msk.f32.mxu1 %vm2031_vm1, %v2032_v22  ;;  %1909 = vmatpush3.bf16.msra.mxu1 %v1908_v31 }
 0x4d9   : > { %1910 = vmatprep.subr.bf16.mxu1 %v2030_v19 }
 0x5a6   : > { %v1040_v10 = vpop.f32.mrb[4].mxu1 }
 0x5a7   : > { %v1843_v11 = vpop.f32.mrb[5].mxu1 }
 0x5aa   : > { %v1207_v12 = vpop.f32.mrb[6].mxu1 }
 0x5ab   : > { %1212 = vrot.lane.b32.xlu1 %v1207_v12, %s2038_s20  ;;  %v1853_v13 = vpop.f32.mrb[7].mxu1 }
 0x61d   : > { %v1213_v14 = vpop.permute.xlu1 %1212 }
 0x61e   : > { %v1215_v15 = vsel %vm873_vm3, %v1040_v10, %v1213_v14 }
 0x61f   : > { %1863 = vmatmul.mubr.msk.f32.vlgmr.msra.gmra.mrb[2].mxu0 %vm792_vm2, %v1215_v15 }
 0x620   : > { %1892 = vmatprep.mubr.msk.f32.mxu0 %vm2031_vm1, %v2032_v22  ;;  %1915 = vmatpush3.bf16.msra.mxu0 %v1914_v45 }
 0x621   : > { %1916 = vmatprep.subr.bf16.mxu0 %v2030_v19 }
 0x624   : > { %1918 = vmatpush3.bf16.msra.mxu0 %v1917_v48 }
 0x625   : > { %1919 = vmatprep.subr.bf16.mxu0 %v2030_v19 }
 0x628   : > { %1921 = vmatpush3.bf16.msra.mxu0 %v1920_v51 }
 0x629   : > { %1922 = vmatprep.subr.bf16.mxu0 %v2030_v19 }
 0x62c   : > { %1924 = vmatpush3.bf16.msra.mxu0 %v1923_v54 }
 0x6f2   : > { %v1296_v17 = vpop.f32.mrb[2].mxu0 }
 0x6f3   : > { %v1297_v18 = vadd.f32 %v1775_v16, %v1296_v17  ;;  %v1864_v20 = vpop.f32.mrb[3].mxu0 }
 0x6f5   : > { %v1300_v21 = vadd.f32 %v1297_v18, %v2253_v24  ;;  %v1333_v24 = vld [vmem:[%s2200_s25 + $0x10] sm:$0xff]  ;;  %s2432_s25 = scalar_lea.vmem %s2389_s9, %s2160_s28  ;;  %v1783_v18 = vld [vmem:[%s732_s24] ss:$0 sm:$0xff] }
 0x6f6   : > { %v1911_v33 = vpack.c.bf16 %v1334_v32, %v1333_v24  ;;  %v1778_v40 = vld [vmem:[%s2432_s25] ss:$0 sm:$0xff] }
 0x6f7   : > { %v1303_v23 = vsel %vm792_vm2, %v1300_v21, 0.0 }
 0x6f8   : > { %1304 = vadd.xlane.f32.xlu0 %v1303_v23  ;;  %1912 = vmatpush3.bf16.msra.mxu1 %v1911_v33 }
 0x785   : > { %v1305_v25 = vpop.xlane.xlu0 %1304 }
 0x786   : > { %v1307_v26 = vmul.f32 0.03125, %v1305_v25 }
 0x788   : > { %v1308_v27 = vsub.f32 %v1300_v21, %v1307_v26  ;;  %v1784_v21 = vld [vmem:[%s735_s4] ss:$0 sm:$0xff] }
 0x78a   : > { %v1309_v28 = vmul.f32 %v1308_v27, %v1308_v27 }
 0x78c   : > { %v1310_v22 = vsel %vm792_vm2, %v1309_v28, 0.0 }
 0x78d   : > { %1311 = vadd.xlane.f32.xlu1 %v1310_v22 }
 0x81a   : > { %v1312_v34 = vpop.xlane.xlu1 %1311 }
 0x81b   : > { %v1313_v35 = vmul.f32 0.03125, %v1312_v34 }
 0x81d   : > { %v1314_v36 = vadd.f32 1e-05, %v1313_v35 }
 0x81f   : > { %1984 = vrsqrt.f32 %v1314_v36 }
 0x829   : > { %v1985_v37 = vpop.eup %1984 }
 0x82a   : > { %v1316_v39 = vmul.f32 %v1985_v37, %v1308_v27 }
 0x82c   : > { %v1323_v41 = vmul.f32 %v1777_v38, %v1316_v39 }
 0x82e   : > { %v1330_v42 = vadd.f32 %v1778_v40, %v1323_v41 }
 0x830   : > { %1874 = vmatmul.mubr.msk.f32.vlgmr.msra.gmra.mrb[8].mxu1 %vm792_vm2, %v1330_v42 }
 0x903   : > { %v1411_v56 = vpop.f32.mrb[8].mxu1 }
 0x904   : > { %v1412_v57 = vadd.f32 %v1779_v55, %v1411_v56  ;;  %v1875_v58 = vpop.f32.mrb[9].mxu1 }
 0x906   : > { %v1416_v59 = vmul.f32 0.044715, %v1412_v57  ;;  %v1415_v1 = vmul.f32 0.5, %v1412_v57 }
 0x908   : > { %v1417_v60 = vmul.f32 %v1416_v59, %v1412_v57 }
 0x90a   : > { %v1418_v61 = vmul.f32 %v1417_v60, %v1412_v57 }
 0x90c   : > { %v1419_v62 = vadd.f32 %v1418_v61, %v1412_v57 }
 0x90e   : > { %v1420_v63 = vmul.f32 0.7978846, %v1419_v62 }
 0x910   : > { %1986 = vtanh.f32 %v1420_v63 }
 0x91a   : > { %v1987_v0 = vpop.eup %1986 }
 0x91b   : > { %v1422_v2 = vadd.f32 1.0, %v1987_v0 }
 0x91d   : > { %v1423_v19 = vmul.f32 %v1422_v2, %v1415_v1 }
 0x91f   : > { %1893 = vmatmul.mubr.msk.f32.vlgmr.msra.gmra.mrb[4].mxu0 %vm1439_vm5, %v1423_v19 }
 0x9f2   : > { %v1509_v4 = vpop.f32.mrb[4].mxu0 }
 0x9f3   : > { %v1510_v5 = vadd.f32 %v1781_v3, %v1509_v4  ;;  %v1894_v6 = vpop.f32.mrb[5].mxu0 }
 0x9f5   : > { %v1513_v7 = vadd.f32 %v1510_v5, %v1330_v42 }
 0x9f7   : > { %v1516_v8 = vsel %vm792_vm2, %v1513_v7, 0.0 }
 0x9f8   : > { %1517 = vadd.xlane.f32.xlu0 %v1516_v8 }
 0xa85   : > { %v1518_v9 = vpop.xlane.xlu0 %1517 }
 0xa86   : > { %v1519_v10 = vmul.f32 0.03125, %v1518_v9 }
 0xa88   : > { %v1520_v11 = vsub.f32 %v1513_v7, %v1519_v10 }
 0xa8a   : > { %v1521_v12 = vmul.f32 %v1520_v11, %v1520_v11 }
 0xa8c   : > { %v1522_v13 = vsel %vm792_vm2, %v1521_v12, 0.0 }
 0xa8d   : > { %1523 = vadd.xlane.f32.xlu0 %v1522_v13 }
 0xb1a   : > { %v1524_v14 = vpop.xlane.xlu0 %1523 }
 0xb1b   : > { %v1525_v15 = vmul.f32 0.03125, %v1524_v14 }
 0xb1d   : > { %v1526_v16 = vadd.f32 1e-05, %v1525_v15 }
 0xb1f   : > { %1988 = vrsqrt.f32 %v1526_v16 }
 0xb29   : > { %v1989_v17 = vpop.eup %1988 }
 0xb2a   : > { %v1528_v20 = vmul.f32 %v1989_v17, %v1520_v11 }
 0xb2c   : > { %v1535_v23 = vmul.f32 %v1783_v18, %v1528_v20 }
 0xb2e   : > { %v1542_v25 = vadd.f32 %v1784_v21, %v1535_v23 }
 0xb30   : > { %1543 = vst.msk [vmem:[#allocation2] sm:$0xff] %vm792_vm2, %v1542_v25 }
 0xb31   : > { %1545 = vst.msk [vmem:[%s742_s18] sm:$0x1] %vm1544_vm6, %v1542_v25 }
 0xb32 PF: > { %s2436_s2 = sld [smem:[#allocation6_spill]]  ;;  %s2437_s21 = sld [smem:[#allocation4_spill]] }
 0xb33   : > { %s2438_s22 = sld [smem:[#allocation5_spill]]  ;;  %s2439_s23 = sld [smem:[#allocation7_spill]] }
 0xb34   : > { %s2440_s24 = sld [smem:[#allocation8_spill]] }
 0xb38   : > { %s26_s25 = sadd.s32 1, %s2436_s2  }
 0xb39   : > { %p23_p8 = scmp.ge.s32.totalorder %s26_s25, 10  }
 0xb3b   :  { %25 = sbr.rel (!%p23_p8) target bundleno = 9 (0x9), region = 157 }

</bundles_post_ra>
